<compile_context>
chip_gen: v5e
topology: v5e:2x2
jax: 0.10.0
libtpu: 0.0.40
codegen_flags: <defaults>
</compile_context>

<pallas_src>
import jax
import jax.numpy as jnp
from jax.experimental import pallas as pl
from jax.experimental.pallas import tpu as pltpu


def _round_up(n: int, m: int) -> int:
    return ((n + m - 1) // m) * m


def _qnet_kernel(x_ref, w1_ref, b1_ref, w2_ref, b2_ref, o_ref):
    # hidden = relu(x @ w1 + b1); f32 accumulation on the MXU.
    # x is (TB, in_size) unpadded; Mosaic pads the small K into the MXU.
    h = jnp.dot(x_ref[...], w1_ref[...], preferred_element_type=jnp.float32)
    h = jnp.maximum(h + b1_ref[...], 0.0)          # epilogue kept in f32 (v5e VPU)
    # Second matmul on full 128-lane tiles (padded cols/rows are exact zeros).
    out = jnp.dot(h.astype(w2_ref.dtype), w2_ref[...],
                  preferred_element_type=jnp.float32)
    out = out + b2_ref[...]
    # Only the real output columns are written back to HBM (narrow writeback).
    o_ref[...] = out[:, : o_ref.shape[1]].astype(o_ref.dtype)


def linear_qnet_forward(x, w1, b1, w2, b2, *, batch_tile=2048,
                        compute_dtype=jnp.bfloat16):
    """Forward pass equivalent to Linear_QNet (PyTorch):
        relu(x @ w1 + b1) @ w2 + b2
    x:  (B, in)          w1: (in, hidden)  b1: (hidden,)
    w2: (hidden, out)    b2: (out,)
    Weights are stored pre-transposed as (in_features, out_features), i.e.
    identical semantics to nn.Linear's  x @ W.T + b.
    """
    B, in_size = x.shape
    hidden = w1.shape[1]
    out_size = w2.shape[1]

    # Lane-pad ONLY the tiny VMEM-resident weights (exact zero padding).
    HID_P = _round_up(hidden, 128)
    OUT_P = _round_up(out_size, 128)

    # Batch tiling: minimal row padding, and >= 2 grid steps when possible so
    # the "parallel" batch axis can shard across TensorCores (v7x megacore).
    B8 = _round_up(B, 8)
    eff_tile = batch_tile
    if B8 >= 16:
        eff_tile = min(eff_tile, _round_up(pl.cdiv(B8, 2), 8))
    n_steps = pl.cdiv(B8, eff_tile)
    TB = _round_up(pl.cdiv(B8, n_steps), 8)
    B_P = n_steps * TB

    # x stays unpadded in the feature dim; only pad batch rows if needed.
    x_c = x.astype(compute_dtype)
    if B_P != B:
        x_c = jnp.zeros((B_P, in_size), compute_dtype).at[:B].set(x_c)

    w1_p = jnp.zeros((in_size, HID_P), compute_dtype).at[:, :hidden].set(
        w1.astype(compute_dtype))
    b1_p = jnp.zeros((1, HID_P), jnp.float32).at[0, :hidden].set(
        b1.astype(jnp.float32))
    w2_p = jnp.zeros((HID_P, OUT_P), compute_dtype).at[:hidden, :out_size].set(
        w2.astype(compute_dtype))
    b2_p = jnp.zeros((1, OUT_P), jnp.float32).at[0, :out_size].set(
        b2.astype(jnp.float32))

    out_p = pl.pallas_call(
        _qnet_kernel,
        out_shape=jax.ShapeDtypeStruct((B_P, out_size), jnp.float32),
        grid_spec=pltpu.PrefetchScalarGridSpec(
            num_scalar_prefetch=0,
            grid=(n_steps,),
            in_specs=[
                # x: blocked over batch, unpadded narrow last dim (= full dim).
                pl.BlockSpec((TB, in_size), lambda i: (i, 0)),
                # Weights / biases: same block for every i -> VMEM resident.
                pl.BlockSpec((in_size, HID_P), lambda i: (0, 0)),
                pl.BlockSpec((1, HID_P), lambda i: (0, 0)),
                pl.BlockSpec((HID_P, OUT_P), lambda i: (0, 0)),
                pl.BlockSpec((1, OUT_P), lambda i: (0, 0)),
            ],
            # Narrow writeback: last dim = full array dim (out_size).
            out_specs=pl.BlockSpec((TB, out_size), lambda i: (i, 0)),
        ),
        compiler_params=pltpu.CompilerParams(
            dimension_semantics=("parallel",),
            vmem_limit_bytes=32 * 1024 * 1024,   # safe even on v7x (64 MiB)
        ),
    )(x_c, w1_p, b1_p, w2_p, b2_p)

    return out_p[:B] if B_P != B else out_p


def init_params(key, input_size, hidden_size, output_size):
    """Deterministic init mimicking PyTorch nn.Linear (uniform +/- 1/sqrt(fan_in)).
    Weights are stored pre-transposed: (in_features, out_features)."""
    k1, k2, k3, k4 = jax.random.split(key, 4)
    bound1 = 1.0 / jnp.sqrt(input_size)
    bound2 = 1.0 / jnp.sqrt(hidden_size)
    w1 = jax.random.uniform(k1, (input_size, hidden_size), jnp.float32, -bound1, bound1)
    b1 = jax.random.uniform(k2, (hidden_size,), jnp.float32, -bound1, bound1)
    w2 = jax.random.uniform(k3, (hidden_size, output_size), jnp.float32, -bound2, bound2)
    b2 = jax.random.uniform(k4, (output_size,), jnp.float32, -bound2, bound2)
    return w1, b1, w2, b2


# TODO(synk): Linear_QNet.save() (torch checkpoint I/O) has no kernel equivalent.


if __name__ == "__main__":
    key = jax.random.PRNGKey(0)
    kx, kp, kx2 = jax.random.split(key, 3)

    # Small shapes consistent with the module (snake-game Q-net).
    batch, input_size, hidden_size, output_size = 8, 11, 32, 3

    x = jax.random.normal(kx, (batch, input_size), dtype=jnp.float32)
    w1, b1, w2, b2 = init_params(kp, input_size, hidden_size, output_size)

    # Pure-JAX reference of the forward semantics.
    def ref_fwd(xx):
        return jnp.maximum(xx @ w1 + b1, 0.0) @ w2 + b2

    # 1) Small-batch f32 path (single grid step, replay-buffer shape).
    out = linear_qnet_forward(x, w1, b1, w2, b2, compute_dtype=jnp.float32)
    jax.block_until_ready(out)
    assert out.shape == (batch, output_size)
    assert jnp.allclose(out, ref_fwd(x), atol=1e-5, rtol=1e-5)

    # 2) Gridded path: multiple batch tiles, batch not a tile multiple (padding
    #    + slice path, 4 grid steps), still f32.
    x_big = jax.random.normal(kx2, (50, input_size), dtype=jnp.float32)
    out_big = linear_qnet_forward(x_big, w1, b1, w2, b2, batch_tile=16,
                                  compute_dtype=jnp.float32)
    jax.block_until_ready(out_big)
    assert out_big.shape == (50, output_size)
    assert jnp.allclose(out_big, ref_fwd(x_big), atol=1e-5, rtol=1e-5)

    # 3) Default bf16 matmul inputs (f32 accumulate + f32 epilogue) — looser tol.
    out_bf16 = linear_qnet_forward(x, w1, b1, w2, b2)
    jax.block_until_ready(out_bf16)
    assert out_bf16.shape == (batch, output_size)
    assert jnp.allclose(out_bf16, ref_fwd(x), atol=0.1, rtol=0.1)

    print("KERNEL_OK")
</pallas_src>

<mosaic_0001>
module attributes {stable_mosaic.version = 11 : i64} {
  func.func @_qnet_kernel(%arg0: i32, %arg1: memref<8x11xf32, #tpu.memory_space<vmem>>, %arg2: memref<11x128xf32, #tpu.memory_space<vmem>>, %arg3: memref<1x128xf32, #tpu.memory_space<vmem>>, %arg4: memref<128x128xf32, #tpu.memory_space<vmem>>, %arg5: memref<1x128xf32, #tpu.memory_space<vmem>>, %arg6: memref<8x3xf32, #tpu.memory_space<vmem>>) attributes {dimension_semantics = [#tpu.dimension_semantics<parallel>], iteration_bounds = array<i64: 1>, scalar_prefetch = 0 : i64, scratch_operands = 0 : i64, tpu.core_type = #tpu.core_type<tc>, window_params = [{transform_indices = @transform_0, window_bounds = array<i64: 8, 11>}, {pipeline_mode = #tpu.pipeline_mode<synchronous>, transform_indices = @transform_1, window_bounds = array<i64: 11, 128>}, {pipeline_mode = #tpu.pipeline_mode<synchronous>, transform_indices = @transform_2, window_bounds = array<i64: 1, 128>}, {pipeline_mode = #tpu.pipeline_mode<synchronous>, transform_indices = @transform_3, window_bounds = array<i64: 128, 128>}, {pipeline_mode = #tpu.pipeline_mode<synchronous>, transform_indices = @transform_4, window_bounds = array<i64: 1, 128>}, {transform_indices = @transform_5, window_bounds = array<i64: 8, 3>}]} {
    %c0 = arith.constant 0 : index
    %c0_0 = arith.constant 0 : index
    %0 = vector.load %arg1[%c0, %c0_0] : memref<8x11xf32, #tpu.memory_space<vmem>>, vector<8x11xf32>
    %c0_1 = arith.constant 0 : index
    %c0_2 = arith.constant 0 : index
    %1 = vector.load %arg2[%c0_1, %c0_2] : memref<11x128xf32, #tpu.memory_space<vmem>>, vector<11x128xf32>
    %cst = arith.constant dense<0.000000e+00> : vector<8x128xf32>
    %2 = tpu.matmul %0, %1, %cst {dimension_numbers = #tpu.dot_dimension_numbers<[1], [0], [0], [1], [0, 0, 1, 1], [], []>} : vector<8x11xf32>, vector<11x128xf32>, vector<8x128xf32> -> vector<8x128xf32>
    %c0_3 = arith.constant 0 : index
    %c0_4 = arith.constant 0 : index
    %3 = vector.load %arg3[%c0_3, %c0_4] : memref<1x128xf32, #tpu.memory_space<vmem>>, vector<1x128xf32>
    %4 = vector.broadcast %3 : vector<1x128xf32> to vector<8x128xf32>
    %5 = arith.addf %2, %4 : vector<8x128xf32>
    %cst_5 = arith.constant 0.000000e+00 : f32
    %6 = vector.broadcast %cst_5 : f32 to vector<8x128xf32>
    %7 = arith.maximumf %5, %6 : vector<8x128xf32>
    %c0_6 = arith.constant 0 : index
    %c0_7 = arith.constant 0 : index
    %8 = vector.load %arg4[%c0_6, %c0_7] : memref<128x128xf32, #tpu.memory_space<vmem>>, vector<128x128xf32>
    %cst_8 = arith.constant dense<0.000000e+00> : vector<8x128xf32>
    %9 = tpu.matmul %7, %8, %cst_8 {dimension_numbers = #tpu.dot_dimension_numbers<[1], [0], [0], [1], [0, 0, 1, 1], [], []>} : vector<8x128xf32>, vector<128x128xf32>, vector<8x128xf32> -> vector<8x128xf32>
    %c0_9 = arith.constant 0 : index
    %c0_10 = arith.constant 0 : index
    %10 = vector.load %arg5[%c0_9, %c0_10] : memref<1x128xf32, #tpu.memory_space<vmem>>, vector<1x128xf32>
    %11 = vector.broadcast %10 : vector<1x128xf32> to vector<8x128xf32>
    %12 = arith.addf %9, %11 : vector<8x128xf32>
    %13 = vector.extract_strided_slice %12 {offsets = [0, 0], sizes = [8, 3], strides = [1, 1]} : vector<8x128xf32> to vector<8x3xf32>
    %c0_11 = arith.constant 0 : index
    %c0_12 = arith.constant 0 : index
    %14 = vector.load %arg6[%c0_11, %c0_12] : memref<8x3xf32, #tpu.memory_space<vmem>>, vector<8x3xf32>
    tpu.vector_store %arg6[%c0_11, %c0_12], %13 {strides = array<i32>} : memref<8x3xf32, #tpu.memory_space<vmem>>, vector<8x3xf32>,
    return
  }
  func.func @transform_0(%arg0: i32) -> (i32, i32) {
    %c0_i32 = arith.constant 0 : i32
    %c0_i32_0 = arith.constant 0 : i32
    return %arg0, %c0_i32 : i32, i32
  }
  func.func @transform_1(%arg0: i32) -> (i32, i32) {
    %c0_i32 = arith.constant 0 : i32
    %c0_i32_0 = arith.constant 0 : i32
    %c0_i32_1 = arith.constant 0 : i32
    return %c0_i32, %c0_i32_0 : i32, i32
  }
  func.func @transform_2(%arg0: i32) -> (i32, i32) {
    %c0_i32 = arith.constant 0 : i32
    %c0_i32_0 = arith.constant 0 : i32
    %c0_i32_1 = arith.constant 0 : i32
    return %c0_i32, %c0_i32_0 : i32, i32
  }
  func.func @transform_3(%arg0: i32) -> (i32, i32) {
    %c0_i32 = arith.constant 0 : i32
    %c0_i32_0 = arith.constant 0 : i32
    %c0_i32_1 = arith.constant 0 : i32
    return %c0_i32, %c0_i32_0 : i32, i32
  }
  func.func @transform_4(%arg0: i32) -> (i32, i32) {
    %c0_i32 = arith.constant 0 : i32
    %c0_i32_0 = arith.constant 0 : i32
    %c0_i32_1 = arith.constant 0 : i32
    return %c0_i32, %c0_i32_0 : i32, i32
  }
  func.func @transform_5(%arg0: i32) -> (i32, i32) {
    %c0_i32 = arith.constant 0 : i32
    %c0_i32_0 = arith.constant 0 : i32
    return %arg0, %c0_i32 : i32, i32
  }
}

</mosaic_0001>

<bundles_post_ra>
// kernel: tpu_custom_call.1
= control target key start
LH: loop header
LB: loop body
LE: loop exit
PB: predicated region body
PF: predicated region fallthrough
CT: control target
= control target key end

     0   :  { %10 = vsyncpa [#allocation3], 0  ;;  %s287_s0 = inlined_call_operand.hbm [shape: f32[8,11], index: 0, kind: input, shape index: {}]   ;;  %s288_s1 = inlined_call_operand.hbm [shape: f32[11,128], index: 1, kind: input, shape index: {}]   ;;  %s289_s2 = inlined_call_operand.vmem [shape: f32[1,128], index: 2, kind: input, shape index: {}]   ;;  %s290_s3 = inlined_call_operand.hbm [shape: f32[128,128], index: 3, kind: input, shape index: {}]   ;;  %s291_s4 = inlined_call_operand.vmem [shape: f32[1,128], index: 4, kind: input, shape index: {}]   ;;  %s292_s5 = inlined_call_operand.vmem [shape: f32[8,3], index: 5, kind: output, shape index: {}]  }
   0x1   :  { %11 = vsyncpa [#allocation5], 0  ;;  %s27_s20 = sshll.u32 %s288_s1, 4  ;;  %s234_s21 = smov [#allocation4]   ;;  %s28_s20 = int_to_ptr.hbm [resolvable:$true] %s27_s20 }
   0x2   :  { %s29_s22 = sshll.u32 %s234_s21, 4  ;;  %s17_s25 = sshll.u32 %s287_s0, 4  ;;  %s30_s22 = int_to_ptr.vmem [resolvable:$true] %s29_s22  ;;  %s18_s25 = int_to_ptr.hbm [resolvable:$true] %s17_s25 }
   0x3   :  { %s235_s26 = smov 128   ;;  %s236_s27 = smov 8  }
   0x4   :  { %35 = dma.hbm_to_vmem [thread:$0]  %s28_s20, 256, %s30_s22, [#allocation5], %s235_s26, %s235_s26, %s236_s27  }
   0x5   :  { %s237_s28 = smov [#allocation2]   ;;  %s42_s7 = sshll.u32 %s290_s3, 4  ;;  %s43_s7 = int_to_ptr.hbm [resolvable:$true] %s42_s7 }
   0x6   :  { %s19_s29 = sshll.u32 %s237_s28, 4  ;;  %s238_s1 = smov [#allocation6]   ;;  %s20_s29 = int_to_ptr.vmem [resolvable:$true] %s19_s29 }
   0x7   :  { %22 = dma.hbm_to_vmem [thread:$0]  %s18_s25, 128, %s20_s29, [#allocation3]  }
   0x8   :  { %s44_s8 = sshll.u32 %s238_s1, 4  ;;  %s45_s8 = int_to_ptr.vmem [resolvable:$true] %s44_s8 }
   0x9   :  { %50 = dma.hbm_to_vmem [thread:$0]  %s43_s7, 2048, %s45_s8, [#allocation5], %s235_s26, %s235_s26, %s236_s27  }
   0xa   :  { %230 = dma.done.wait [#allocation3], 128  }
   0xb   :  { %231 = vsyncadd [#allocation3], 4294967168 }
   0xc   :  { %232 = dma.done.wait [#allocation5], 2304  }
   0xd   :  { %233 = vsyncadd [#allocation5], 4294964992  ;;  %vm76_vm0 = vcmask 1042432   ;;  %v67_v0 = vld [vmem:[#allocation4 + $0x8] sm:$0x7]  ;;  %v66_v1 = vld [vmem:[#allocation4] sm:$0xff] }
   0xe   :  { %149 = vmatpush.msk.msra.mxu0 %vm76_vm0, %v67_v0  ;;  %v65_v2 = vld [vmem:[#allocation2] sm:$0xff]  ;;  %vm72_vm1 = vcmask 89088   ;;  %v116_v3 = vld [vmem:[#allocation6 + $0x78] sm:$0xff]  ;;  %v115_v4 = vld [vmem:[#allocation6 + $0x70] sm:$0xff]  ;;  %vm141_vm2 = vcmask 23552  }
   0xf   :  { %121 = vmatpush.msra.mxu1 %v116_v3  ;;  %v114_v5 = vld [vmem:[#allocation6 + $0x68] sm:$0xff]  ;;  %v113_v6 = vld [vmem:[#allocation6 + $0x60] sm:$0xff]  ;;  %v112_v7 = vld [vmem:[#allocation6 + $0x58] sm:$0xff] }
  0x10   :  { %95 = vmatpush.msra.mxu0 %v66_v1  ;;  %v111_v8 = vld [vmem:[#allocation6 + $0x50] sm:$0xff]  ;;  %v110_v9 = vld [vmem:[#allocation6 + $0x48] sm:$0xff]  ;;  %v109_v10 = vld [vmem:[#allocation6 + $0x40] sm:$0xff] }
  0x11   :  { %150 = vmatmul.msk.f32.vlgmr.msra.gmra.mxu0 %vm72_vm1, %v65_v2  ;;  %122 = vmatpush.msra.mxu1 %v115_v4  ;;  %v108_v11 = vld [vmem:[#allocation6 + $0x38] sm:$0xff]  ;;  %v107_v12 = vld [vmem:[#allocation6 + $0x30] sm:$0xff]  ;;  %v106_v13 = vld [vmem:[#allocation6 + $0x28] sm:$0xff] }
  0x12   :  { %v105_v14 = vld [vmem:[#allocation6 + $0x20] sm:$0xff]  ;;  %v104_v15 = vld [vmem:[#allocation6 + $0x18] sm:$0xff]  ;;  %v103_v16 = vld [vmem:[#allocation6 + $0x10] sm:$0xff] }
  0x13   :  { %123 = vmatpush.msra.mxu1 %v114_v5  ;;  %v102_v17 = vld [vmem:[#allocation6 + $0x8] sm:$0xff]  ;;  %v101_v18 = vld [vmem:[#allocation6] sm:$0xff] }
  0x14   :  { %v156_v19 = vld [vmem:[%s289_s2] ss:$0 sm:$0xff] }
  0x15   :  { %124 = vmatpush.msra.mxu1 %v113_v6  ;;  %v157_v23 = vld [vmem:[%s291_s4] ss:$0 sm:$0xff] }
  0x17   :  { %125 = vmatpush.msra.mxu1 %v112_v7 }
  0x19   :  { %126 = vmatpush.msra.mxu1 %v111_v8 }
  0x1b   :  { %127 = vmatpush.msra.mxu1 %v110_v9 }
  0x1d   :  { %128 = vmatpush.msra.mxu1 %v109_v10 }
  0x1f   :  { %129 = vmatpush.msra.mxu1 %v108_v11 }
  0x21   :  { %130 = vmatpush.msra.mxu1 %v107_v12 }
  0x23   :  { %131 = vmatpush.msra.mxu1 %v106_v13 }
  0x25   :  { %132 = vmatpush.msra.mxu1 %v105_v14 }
  0x27   :  { %133 = vmatpush.msra.mxu1 %v104_v15 }
  0x29   :  { %134 = vmatpush.msra.mxu1 %v103_v16 }
  0x2b   :  { %135 = vmatpush.msra.mxu1 %v102_v17 }
  0x2d   :  { %136 = vmatpush.msra.mxu1 %v101_v18 }
  0x8e   :  { %v97_v20 = vpop.f32.mrf.mxu0 }
  0x8f   :  { %v98_v21 = vadd.f32 %v156_v19, %v97_v20 }
  0x91   :  { %v100_v22 = vmax.f32 %v98_v21, 0.0 }
  0x93   :  { %137 = vmatmul.f32.vlgmr.msra.gmra.mxu1 %v100_v22 }
 0x110   :  { %v138_v24 = vpop.f32.mrf.mxu1 }
 0x111   :  { %v139_v25 = vadd.f32 %v157_v23, %v138_v24 }
 0x113   :  { %142 = vst.msk [vmem:[%s292_s5] sm:$0xff] %vm141_vm2, %v139_v25 }
 0x114   :  { %147 = vsyncpa [#allocation3], 1 }
 0x115   :  { %148 = vsyncpa [#allocation5], 1 }

</bundles_post_ra>
